<compile_context>
chip_gen: v6e
topology: v6e:2x2x1
jax: 0.10.0
libtpu: 0.0.40
codegen_flags: <defaults>
</compile_context>

<pallas_src>
import jax
import jax.numpy as jnp
from jax.experimental import pallas as pl
from jax.experimental.pallas import tpu as pltpu


def _connection_head_kernel(feat_hbm_ref, inter_flat_ref, union_ref):
    # feat_hbm_ref: raw HBM ref (memory_space=pl.ANY), intentionally unused —
    # matches the PyTorch forward, which only uses feature.shape[0].
    del feat_hbm_ref
    TB = union_ref.shape[0]
    P = union_ref.shape[-1]
    # eye(P) flattened row-major has ones exactly at flat indices k*(P+1).
    idx = jax.lax.broadcasted_iota(jnp.int32, (TB, P * P), 1)
    inter_flat_ref[...] = ((idx % (P + 1)) == 0).astype(inter_flat_ref.dtype)
    union_ref[...] = jnp.ones(union_ref.shape, dtype=union_ref.dtype)


def _choose_batch_tile(B, P):
    """Pick a batch tile TB: big enough to amortize per-step overhead, small
    enough that double-buffered output blocks fit comfortably in VMEM (v7x has
    only 64 MiB), and leaving >= 2 grid steps when B is large (v7x megacore)."""
    if B <= 8:
        # Single block covering the whole batch (block dim == full array dim,
        # so the sublane constraint is satisfied for any B).
        return B
    bytes_per_row = (P * P + P) * 4  # f32 intersection-flat + union per batch row
    vmem_budget = 8 * 1024 * 1024    # double-buffered outputs stay far below 64 MiB
    tb = min(B, 1024, max(8, vmem_budget // (2 * bytes_per_row)))
    # Keep at least 2 grid steps so the parallel batch axis can use both
    # TensorCores on v7x (harmless on single-TC v5e/v6e).
    tb = min(tb, -(-B // 2))
    # Sublane-aligned block (multiple of 8); ragged tail handled by pl.cdiv grid
    # + writeback clipping (constant fill, so partial blocks are still correct).
    tb = max(8, (tb // 8) * 8)
    return tb


def csg_stump_connection_union_head(feature, num_primitives, num_intersections,
                                    is_training=False):
    assert num_primitives == num_intersections, (
        "union only requires intersection nodes and number of primitive to be equal"
    )
    del is_training  # unused, as in the PyTorch module
    B = feature.shape[0]
    P = num_primitives

    TB = _choose_batch_tile(B, P)
    num_blocks = pl.cdiv(B, TB)

    inter_flat, union_w = pl.pallas_call(
        _connection_head_kernel,
        out_shape=(
            jax.ShapeDtypeStruct((B, P * P), jnp.float32),
            jax.ShapeDtypeStruct((B, P), jnp.float32),
        ),
        grid=(num_blocks,),
        # Feature stays in HBM; no HBM->VMEM DMA is generated for it.
        in_specs=[pl.BlockSpec(memory_space=pl.ANY)],
        out_specs=(
            pl.BlockSpec((TB, P * P), lambda b: (b, 0)),
            pl.BlockSpec((TB, P), lambda b: (b, 0)),
        ),
        compiler_params=pltpu.CompilerParams(
            dimension_semantics=("parallel",),
        ),
    )(feature)

    # Free row-major reshape outside the kernel (lane-dense inside the kernel).
    return inter_flat.reshape(B, P, P), union_w


if __name__ == "__main__":
    # Small, deterministic example consistent with the module's forward.
    B = 2
    feature_dim = 32
    num_primitives = 8
    num_intersections = 8

    key = jax.random.PRNGKey(0)
    feature = jax.random.normal(key, (B, feature_dim), dtype=jnp.float32)

    inter_w, union_w = csg_stump_connection_union_head(
        feature, num_primitives, num_intersections, is_training=True
    )
    jax.block_until_ready((inter_w, union_w))

    # Reference check against the PyTorch semantics.
    ref_inter = jnp.broadcast_to(
        jnp.eye(num_primitives, dtype=jnp.float32)[None],
        (B, num_primitives, num_primitives),
    )
    ref_union = jnp.ones((B, num_intersections), dtype=jnp.float32)

    assert inter_w.shape == (B, num_primitives, num_primitives)
    assert union_w.shape == (B, num_intersections)
    assert jnp.array_equal(inter_w, ref_inter)
    assert jnp.array_equal(union_w, ref_union)

    print("KERNEL_OK")
</pallas_src>

<mosaic_0001>
module attributes {stable_mosaic.version = 11 : i64} {
  func.func @_connection_head_kernel(%arg0: i32, %arg1: memref<2x32xf32, #tpu.memory_space<any>>, %arg2: memref<2x64xf32, #tpu.memory_space<vmem>>, %arg3: memref<2x8xf32, #tpu.memory_space<vmem>>) attributes {dimension_semantics = [#tpu.dimension_semantics<parallel>], iteration_bounds = array<i64: 1>, scalar_prefetch = 0 : i64, scratch_operands = 0 : i64, tpu.core_type = #tpu.core_type<tc>, window_params = [{}, {transform_indices = @transform_1, window_bounds = array<i64: 2, 64>}, {transform_indices = @transform_2, window_bounds = array<i64: 2, 8>}]} {
    %0 = tpu.iota {dimensions = array<i32: 1>} : vector<2x64xi32>
    %c9_i32 = arith.constant 9 : i32
    %c0_i32 = arith.constant 0 : i32
    %1 = arith.cmpi eq, %c9_i32, %c0_i32 : i32
    %c1_i32 = arith.constant 1 : i32
    %2 = arith.select %1, %c1_i32, %c9_i32 : i32
    %3 = vector.broadcast %2 : i32 to vector<2x64xi32>
    %4 = arith.remsi %0, %3 : vector<2x64xi32>
    %c0_i32_0 = arith.constant 0 : i32
    %5 = vector.broadcast %c0_i32_0 : i32 to vector<2x64xi32>
    %6 = arith.cmpi ne, %4, %5 : vector<2x64xi32>
    %c0_i32_1 = arith.constant 0 : i32
    %7 = vector.broadcast %c0_i32_1 : i32 to vector<2x64xi32>
    %8 = arith.cmpi slt, %4, %7 : vector<2x64xi32>
    %c0_i32_2 = arith.constant 0 : i32
    %9 = arith.cmpi slt, %2, %c0_i32_2 : i32
    %10 = vector.broadcast %9 : i1 to vector<2x64xi1>
    %11 = vector.broadcast %10 : vector<2x64xi1> to vector<2x64xi1>
    %12 = arith.xori %8, %11 : vector<2x64xi1>
    %13 = arith.andi %12, %6 : vector<2x64xi1>
    %14 = vector.broadcast %2 : i32 to vector<2x64xi32>
    %15 = arith.addi %4, %14 : vector<2x64xi32>
    %16 = arith.select %13, %15, %4 : vector<2x64xi1>, vector<2x64xi32>
    %c0_i32_3 = arith.constant 0 : i32
    %17 = vector.broadcast %c0_i32_3 : i32 to vector<2x64xi32>
    %18 = arith.cmpi eq, %16, %17 : vector<2x64xi32>
    %19 = arith.extui %18 : vector<2x64xi1> to vector<2x64xi32>
    %20 = arith.sitofp %19 : vector<2x64xi32> to vector<2x64xf32>
    %c0 = arith.constant 0 : index
    %c0_4 = arith.constant 0 : index
    %21 = vector.load %arg2[%c0, %c0_4] : memref<2x64xf32, #tpu.memory_space<vmem>>, vector<2x64xf32>
    tpu.vector_store %arg2[%c0, %c0_4], %20 {strides = array<i32>} : memref<2x64xf32, #tpu.memory_space<vmem>>, vector<2x64xf32>,
    %cst = arith.constant 1.000000e+00 : f32
    %22 = vector.broadcast %cst : f32 to vector<2x8xf32>
    %c0_5 = arith.constant 0 : index
    %c0_6 = arith.constant 0 : index
    %23 = vector.load %arg3[%c0_5, %c0_6] : memref<2x8xf32, #tpu.memory_space<vmem>>, vector<2x8xf32>
    tpu.vector_store %arg3[%c0_5, %c0_6], %22 {strides = array<i32>} : memref<2x8xf32, #tpu.memory_space<vmem>>, vector<2x8xf32>,
    return
  }
  func.func @transform_1(%arg0: i32) -> (i32, i32) {
    %c0_i32 = arith.constant 0 : i32
    %c0_i32_0 = arith.constant 0 : i32
    return %arg0, %c0_i32 : i32, i32
  }
  func.func @transform_2(%arg0: i32) -> (i32, i32) {
    %c0_i32 = arith.constant 0 : i32
    %c0_i32_0 = arith.constant 0 : i32
    return %arg0, %c0_i32 : i32, i32
  }
}

</mosaic_0001>

<bundles_post_ra>
// kernel: tpu_custom_call.1
= control target key start
LH: loop header
LB: loop body
LE: loop exit
PB: predicated region body
PF: predicated region fallthrough
CT: control target
= control target key end

     0   :  { %8 = vsyncpa [#allocation3], 0  ;;  %v10_v0 = vlaneseq  ;;  %vm33_vm0 = vcmask 58368   ;;  %s143_s0 = inlined_call_operand.hbm [shape: f32[2,32], index: 0, kind: input, shape index: {}]   ;;  %s144_s1 = inlined_call_operand.hbm [shape: f32[2,64], index: 1, kind: output, shape index: {0}]   ;;  %s145_s2 = inlined_call_operand.hbm [shape: f32[2,8], index: 2, kind: output, shape index: {1}]  }
   0x1   :  { %9 = vsyncpa [#allocation5], 0  ;;  %v114_v2 = vmov 1.0   ;;  %s115_s9 = smov [#allocation4]  }
   0x2   :  { %v11_v1 = vand.u32 127, %v10_v0  ;;  %34 = vst.msk [vmem:[#allocation4] sm:$0x3] %vm33_vm0, %v114_v2  ;;  %s51_s10 = sshll.u32 %s115_s9, 4  ;;  %s52_s10 = int_to_ptr.vmem [resolvable:$true] %s51_s10 }
   0x3   :  { %s70_s0 = scalar_lea.vmem %s52_s10, 32  ;;  %p75_p1 = scmp.lt.s32.totalorder %s52_s10, %s52_s10 }
   0x4   :  { %v133_v3 = vmul.u32.u64.low 3817748708, %v11_v1  ;;  %v134_v4 = vmul.u32.u64.high 3817748708, %v11_v1, %v133_v3  ;;  %p71_p0 = scmp.ne.s32.totalorder %s52_s10, %s70_s0  ;;  %p76_p2 = scmp.lt.s32.totalorder %s70_s0, %s70_s0 }
   0x6   :  { %p77_p3 = por %p76_p2, %p75_p1 }
   0x8   :  { %p78_p4 = pnand %p77_p3, %p71_p0 }
   0xa   :  { %81 = shalt.err (!%p78_p4)
}
   0xb   :  { %54 = dma.vmem_to_hbm [thread:$0]  %s52_s10, 32, %s145_s2, [#allocation5]   ;;  %v18_v5 = vshrl.u32 %v134_v4, 3  ;;  %vm31_vm4 = vcmask 517120   ;;  %v117_v10 = vmov 0.0  }
   0xc   :  { %s116_s13 = smov [#allocation2]  }
   0xd   :  { %v19_v6 = vmul.u32 9, %v18_v5  ;;  %s41_s14 = sshll.u32 %s116_s13, 4  ;;  %s42_s14 = int_to_ptr.vmem [resolvable:$true] %s41_s14 }
   0xe   :  { %s90_s15 = scalar_lea.vmem %s42_s14, 32  ;;  %p95_p6 = scmp.lt.s32.totalorder %s42_s14, %s42_s14 }
   0xf   :  { %v20_v7 = vsub.s32 %v11_v1, %v19_v6  ;;  %p91_p5 = scmp.ne.s32.totalorder %s42_s14, %s90_s15  ;;  %p96_p7 = scmp.lt.s32.totalorder %s90_s15, %s90_s15 }
  0x11   :  { %vm23_vm1 = vcmp.ne.s32.totalorder %v20_v7, 0  ;;  %vm24_vm2 = vcmp.lt.s32.totalorder %v20_v7, 0  ;;  %v26_v8 = vadd.s32 9, %v20_v7  ;;  %p97_p8 = por %p96_p7, %p95_p6 }
  0x12   :  { %vm25_vm3 = vmand %vm24_vm2, %vm23_vm1 }
  0x13   :  { %v27_v9 = vsel %vm25_vm3, %v26_v8, %v20_v7  ;;  %p98_p9 = pnand %p97_p8, %p91_p5 }
  0x14   :  { %vm28_vm5 = vcmp.eq.s32.totalorder %v27_v9, 0 }
  0x15   :  { %v63_v11 = vsel %vm28_vm5, 1.0, %v117_v10 }
  0x16   :  { %32 = vst.msk [vmem:[#allocation2] sm:$0x3] %vm31_vm4, %v63_v11 }
  0x17   :  { %101 = shalt.err (!%p98_p9)
}
  0x18   :  { %44 = dma.vmem_to_hbm [thread:$0]  %s42_s14, 32, %s144_s1, [#allocation3]  }
  0x19   :  { %110 = dma.done.wait [#allocation3], 32  }
  0x1a   :  { %111 = vsyncadd [#allocation3], 4294967264 }
  0x1b   :  { %112 = dma.done.wait [#allocation5], 32  }
  0x1c   :  { %113 = vsyncadd [#allocation5], 4294967264 }
  0x1d   :  { %61 = vsyncpa [#allocation3], 1 }
  0x1e   :  { %62 = vsyncpa [#allocation5], 1 }

</bundles_post_ra>
